<compile_context>
chip_gen: v5e
topology: v5e:2x2
jax: 0.10.0
libtpu: 0.0.40
codegen_flags: <defaults>
</compile_context>

<pallas_src>
import jax
import jax.numpy as jnp
from jax.experimental import pallas as pl
from jax.experimental.pallas import tpu as pltpu

IN_F, HID_F, OUT_F = 4, 8, 3          # logical sizes (match nn.Linear(4,8), nn.Linear(8,3))
IN_PAD, HID_PAD, OUT_PAD = 8, 128, 128  # padded, tile/lane-aligned sizes


def _round_up(n, m):
    return ((n + m - 1) // m) * m


def _iris_kernel(x_ref, w1_ref, bias_ref, w2_ref, o_ref):
    # Hidden layer: h = relu(x @ W1 + b1)   -- all operands tile-aligned, h is (TB, 128)
    h = jnp.dot(x_ref[...], w1_ref[...], preferred_element_type=jnp.float32)
    h = jnp.maximum(h + bias_ref[0:1, :], 0.0)
    # Output layer: y = h @ W2 + b2         -- lane-dense (TB, 128) output store
    y = jnp.dot(h, w2_ref[...], preferred_element_type=jnp.float32)
    o_ref[...] = (y + bias_ref[1:2, :]).astype(o_ref.dtype)


def iris_forward(x, w1, b1, w2, b2, *, block_b=1024):
    """x: (B, 4) f32 -> (B, 3) f32.

    w1: (4, 8), b1: (1, 8), w2: (8, 3), b2: (1, 3)  (weights stored as (in, out),
    i.e. transposed vs. PyTorch's Linear.weight, so y = x @ W + b).
    """
    B = x.shape[0]

    # --- one-time wrapper-side zero padding (outside the kernel) -------------------
    w1p = jnp.zeros((IN_PAD, HID_PAD), jnp.float32).at[:IN_F, :HID_F].set(w1)
    w2p = jnp.zeros((HID_PAD, OUT_PAD), jnp.float32).at[:HID_F, :OUT_F].set(w2)
    biasp = (jnp.zeros((2, HID_PAD), jnp.float32)
             .at[0, :HID_F].set(b1.reshape(-1))
             .at[1, :OUT_F].set(b2.reshape(-1)))

    # --- batch tiling: TB multiple of 8, pad B up to a multiple of TB --------------
    tb = min(block_b, _round_up(B, 8))
    b_pad = _round_up(B, tb)
    xp = jnp.zeros((b_pad, IN_PAD), jnp.float32).at[:B, :IN_F].set(x)

    grid = (b_pad // tb,)
    out = pl.pallas_call(
        _iris_kernel,
        out_shape=jax.ShapeDtypeStruct((b_pad, OUT_PAD), jnp.float32),
        grid_spec=pltpu.PrefetchScalarGridSpec(
            num_scalar_prefetch=0,
            grid=grid,
            in_specs=[
                # batch tile: streams / double-buffers over the grid
                pl.BlockSpec((tb, IN_PAD), lambda i: (i, 0),
                             memory_space=pltpu.MemorySpace.VMEM),
                # weights & biases: constant index -> resident in VMEM across steps
                pl.BlockSpec((IN_PAD, HID_PAD), lambda i: (0, 0),
                             memory_space=pltpu.MemorySpace.VMEM),
                pl.BlockSpec((2, HID_PAD), lambda i: (0, 0),
                             memory_space=pltpu.MemorySpace.VMEM),
                pl.BlockSpec((HID_PAD, OUT_PAD), lambda i: (0, 0),
                             memory_space=pltpu.MemorySpace.VMEM),
            ],
            out_specs=pl.BlockSpec((tb, OUT_PAD), lambda i: (i, 0),
                                   memory_space=pltpu.MemorySpace.VMEM),
        ),
        compiler_params=pltpu.CompilerParams(
            dimension_semantics=("parallel",)),  # lets v7x shard batch over both TCs
    )(xp, w1p, biasp, w2p)

    return out[:B, :OUT_F]


def init_params(key):
    """Deterministic synthetic parameters matching nn.Linear(4,8), nn.Linear(8,3)."""
    k1, k2, k3, k4 = jax.random.split(key, 4)
    w1 = jax.random.uniform(k1, (IN_F, HID_F), jnp.float32, -0.5, 0.5)
    b1 = jax.random.uniform(k2, (1, HID_F), jnp.float32, -0.5, 0.5)
    bound = 1.0 / jnp.sqrt(float(HID_F))
    w2 = jax.random.uniform(k3, (HID_F, OUT_F), jnp.float32, -bound, bound)
    b2 = jax.random.uniform(k4, (1, OUT_F), jnp.float32, -bound, bound)
    return w1, b1, w2, b2


def reference_forward(x, w1, b1, w2, b2):
    h = jnp.maximum(x @ w1 + b1, 0.0)
    return h @ w2 + b2


if __name__ == "__main__":
    key = jax.random.PRNGKey(0)
    kx, kp, kx2 = jax.random.split(key, 3)
    w1, b1, w2, b2 = init_params(kp)

    # Small canonical check (B=8, single grid step).
    B = 8
    x = jax.random.normal(kx, (B, IN_F), jnp.float32)
    out = jax.block_until_ready(iris_forward(x, w1, b1, w2, b2))
    ref = reference_forward(x, w1, b1, w2, b2)
    assert out.shape == (B, OUT_F)
    assert jnp.allclose(out, ref, atol=1e-5, rtol=1e-5)

    # Exercise batch tiling + padding path (B not a multiple of the tile, grid > 1).
    B2 = 300
    x2 = jax.random.normal(kx2, (B2, IN_F), jnp.float32)
    out2 = jax.block_until_ready(iris_forward(x2, w1, b1, w2, b2, block_b=128))
    ref2 = reference_forward(x2, w1, b1, w2, b2)
    assert out2.shape == (B2, OUT_F)
    assert jnp.allclose(out2, ref2, atol=1e-5, rtol=1e-5)

    print("KERNEL_OK")
</pallas_src>

<mosaic_0001>
module attributes {stable_mosaic.version = 11 : i64} {
  func.func @_iris_kernel(%arg0: i32, %arg1: memref<8x8xf32, #tpu.memory_space<vmem>>, %arg2: memref<8x128xf32, #tpu.memory_space<vmem>>, %arg3: memref<2x128xf32, #tpu.memory_space<vmem>>, %arg4: memref<128x128xf32, #tpu.memory_space<vmem>>, %arg5: memref<8x128xf32, #tpu.memory_space<vmem>>) attributes {dimension_semantics = [#tpu.dimension_semantics<parallel>], iteration_bounds = array<i64: 1>, scalar_prefetch = 0 : i64, scratch_operands = 0 : i64, tpu.core_type = #tpu.core_type<tc>, window_params = [{transform_indices = @transform_0, window_bounds = array<i64: 8, 8>}, {pipeline_mode = #tpu.pipeline_mode<synchronous>, transform_indices = @transform_1, window_bounds = array<i64: 8, 128>}, {pipeline_mode = #tpu.pipeline_mode<synchronous>, transform_indices = @transform_2, window_bounds = array<i64: 2, 128>}, {pipeline_mode = #tpu.pipeline_mode<synchronous>, transform_indices = @transform_3, window_bounds = array<i64: 128, 128>}, {transform_indices = @transform_4, window_bounds = array<i64: 8, 128>}]} {
    %c0 = arith.constant 0 : index
    %c0_0 = arith.constant 0 : index
    %0 = vector.load %arg1[%c0, %c0_0] : memref<8x8xf32, #tpu.memory_space<vmem>>, vector<8x8xf32>
    %c0_1 = arith.constant 0 : index
    %c0_2 = arith.constant 0 : index
    %1 = vector.load %arg2[%c0_1, %c0_2] : memref<8x128xf32, #tpu.memory_space<vmem>>, vector<8x128xf32>
    %cst = arith.constant dense<0.000000e+00> : vector<8x128xf32>
    %2 = tpu.matmul %0, %1, %cst {dimension_numbers = #tpu.dot_dimension_numbers<[1], [0], [0], [1], [0, 0, 1, 1], [], []>} : vector<8x8xf32>, vector<8x128xf32>, vector<8x128xf32> -> vector<8x128xf32>
    %c0_3 = arith.constant 0 : index
    %c0_4 = arith.constant 0 : index
    %3 = vector.load %arg3[%c0_3, %c0_4] : memref<2x128xf32, #tpu.memory_space<vmem>>, vector<1x128xf32>
    %4 = vector.broadcast %3 : vector<1x128xf32> to vector<8x128xf32>
    %5 = arith.addf %2, %4 : vector<8x128xf32>
    %cst_5 = arith.constant 0.000000e+00 : f32
    %6 = vector.broadcast %cst_5 : f32 to vector<8x128xf32>
    %7 = arith.maximumf %5, %6 : vector<8x128xf32>
    %c0_6 = arith.constant 0 : index
    %c0_7 = arith.constant 0 : index
    %8 = vector.load %arg4[%c0_6, %c0_7] : memref<128x128xf32, #tpu.memory_space<vmem>>, vector<128x128xf32>
    %cst_8 = arith.constant dense<0.000000e+00> : vector<8x128xf32>
    %9 = tpu.matmul %7, %8, %cst_8 {dimension_numbers = #tpu.dot_dimension_numbers<[1], [0], [0], [1], [0, 0, 1, 1], [], []>} : vector<8x128xf32>, vector<128x128xf32>, vector<8x128xf32> -> vector<8x128xf32>
    %c1 = arith.constant 1 : index
    %c0_9 = arith.constant 0 : index
    %10 = vector.load %arg3[%c1, %c0_9] : memref<2x128xf32, #tpu.memory_space<vmem>>, vector<1x128xf32>
    %11 = vector.broadcast %10 : vector<1x128xf32> to vector<8x128xf32>
    %12 = arith.addf %9, %11 : vector<8x128xf32>
    %c0_10 = arith.constant 0 : index
    %c0_11 = arith.constant 0 : index
    %13 = vector.load %arg5[%c0_10, %c0_11] : memref<8x128xf32, #tpu.memory_space<vmem>>, vector<8x128xf32>
    tpu.vector_store %arg5[%c0_10, %c0_11], %12 {strides = array<i32>} : memref<8x128xf32, #tpu.memory_space<vmem>>, vector<8x128xf32>,
    return
  }
  func.func @transform_0(%arg0: i32) -> (i32, i32) {
    %c0_i32 = arith.constant 0 : i32
    %c0_i32_0 = arith.constant 0 : i32
    return %arg0, %c0_i32 : i32, i32
  }
  func.func @transform_1(%arg0: i32) -> (i32, i32) {
    %c0_i32 = arith.constant 0 : i32
    %c0_i32_0 = arith.constant 0 : i32
    %c0_i32_1 = arith.constant 0 : i32
    return %c0_i32, %c0_i32_0 : i32, i32
  }
  func.func @transform_2(%arg0: i32) -> (i32, i32) {
    %c0_i32 = arith.constant 0 : i32
    %c0_i32_0 = arith.constant 0 : i32
    %c0_i32_1 = arith.constant 0 : i32
    return %c0_i32, %c0_i32_0 : i32, i32
  }
  func.func @transform_3(%arg0: i32) -> (i32, i32) {
    %c0_i32 = arith.constant 0 : i32
    %c0_i32_0 = arith.constant 0 : i32
    %c0_i32_1 = arith.constant 0 : i32
    return %c0_i32, %c0_i32_0 : i32, i32
  }
  func.func @transform_4(%arg0: i32) -> (i32, i32) {
    %c0_i32 = arith.constant 0 : i32
    %c0_i32_0 = arith.constant 0 : i32
    return %arg0, %c0_i32 : i32, i32
  }
}

</mosaic_0001>

<bundles_post_ra>
// kernel: tpu_custom_call.1
= control target key start
LH: loop header
LB: loop body
LE: loop exit
PB: predicated region body
PF: predicated region fallthrough
CT: control target
= control target key end

     0   :  { %9 = vsyncpa [#allocation3], 0  ;;  %s347_s0 = inlined_call_operand.hbm [shape: f32[8,8], index: 0, kind: input, shape index: {}]   ;;  %s348_s1 = inlined_call_operand.hbm [shape: f32[8,128], index: 1, kind: input, shape index: {}]   ;;  %s349_s2 = inlined_call_operand.hbm [shape: f32[2,128], index: 2, kind: input, shape index: {}]   ;;  %s350_s3 = inlined_call_operand.hbm [shape: f32[128,128], index: 3, kind: input, shape index: {}]   ;;  %s351_s4 = inlined_call_operand.hbm [shape: f32[8,128], index: 4, kind: output, shape index: {}]  }
   0x1   :  { %10 = vsyncpa [#allocation6], 0 }
   0x2   :  { %11 = vsyncpa [#allocation9], 0  ;;  %s29_s17 = sshll.u32 %s348_s1, 4  ;;  %s30_s17 = int_to_ptr.hbm [resolvable:$true] %s29_s17 }
   0x3   :  { %12 = vsyncpa [#allocation4], 0  ;;  %s300_s18 = smov [#allocation5]   ;;  %s18_s22 = sshll.u32 %s347_s0, 4  ;;  %s19_s22 = int_to_ptr.hbm [resolvable:$true] %s18_s22 }
   0x4   :  { %s31_s19 = sshll.u32 %s300_s18, 4  ;;  %s301_s23 = smov [#allocation2]   ;;  %s32_s19 = int_to_ptr.vmem [resolvable:$true] %s31_s19 }
   0x5   :  { %34 = dma.hbm_to_vmem [thread:$0]  %s30_s17, 128, %s32_s19, [#allocation6]  }
   0x6   :  { %s20_s24 = sshll.u32 %s301_s23, 4  ;;  %s40_s27 = sshll.u32 %s349_s2, 4  ;;  %s21_s24 = int_to_ptr.vmem [resolvable:$true] %s20_s24  ;;  %s41_s27 = int_to_ptr.hbm [resolvable:$true] %s40_s27 }
   0x7   :  { %23 = dma.hbm_to_vmem [thread:$0]  %s19_s22, 128, %s21_s24, [#allocation3]  }
   0x8   :  { %s50_s29 = sshll.u32 %s350_s3, 4  ;;  %s302_s30 = smov [#allocation7]   ;;  %s51_s29 = int_to_ptr.hbm [resolvable:$true] %s50_s29 }
   0x9   :  { %s42_s5 = sshll.u32 %s302_s30, 4  ;;  %s303_s0 = smov [#allocation8]   ;;  %s43_s5 = int_to_ptr.vmem [resolvable:$true] %s42_s5 }
   0xa   :  { %45 = dma.hbm_to_vmem [thread:$0]  %s41_s27, 32, %s43_s5, [#allocation6]  }
   0xb   :  { %s52_s6 = sshll.u32 %s303_s0, 4  ;;  %s304_s7 = smov 128   ;;  %s53_s6 = int_to_ptr.vmem [resolvable:$true] %s52_s6 }
   0xc   :  { %s305_s8 = smov 8  }
   0xd   :  { %58 = dma.hbm_to_vmem [thread:$0]  %s51_s29, 2048, %s53_s6, [#allocation9], %s304_s7, %s304_s7, %s305_s8  }
   0xe   :  { %292 = dma.done.wait [#allocation3], 128  }
   0xf   :  { %293 = vsyncadd [#allocation3], 4294967168 }
  0x10   :  { %294 = dma.done.wait [#allocation6], 160  }
  0x11   :  { %295 = vsyncadd [#allocation6], 4294967136 }
  0x12   :  { %296 = dma.done.wait [#allocation9], 2048  }
  0x13   :  { %297 = vsyncadd [#allocation9], 4294965248  ;;  %vm79_vm0 = vcmask 64512   ;;  %v76_v0 = vld [vmem:[#allocation5] sm:$0xff]  ;;  %v75_v1 = vld [vmem:[#allocation2] sm:$0xff]  ;;  %s306_s2 = smov [#allocation10]  }
  0x14   :  { %v119_v2 = vld [vmem:[#allocation8 + $0x78] sm:$0xff]  ;;  %98 = vmatpush.msra.mxu0 %v76_v0  ;;  %v118_v3 = vld [vmem:[#allocation8 + $0x70] sm:$0xff]  ;;  %v117_v4 = vld [vmem:[#allocation8 + $0x68] sm:$0xff]  ;;  %s148_s3 = sshll.u32 %s306_s2, 4  ;;  %s150_s11 = sshll.u32 %s351_s4, 4  ;;  %s149_s3 = int_to_ptr.vmem [resolvable:$true] %s148_s3  ;;  %s151_s11 = int_to_ptr.hbm [resolvable:$true] %s150_s11 }
  0x15   :  { %122 = vmatpush.msra.mxu1 %v119_v2  ;;  %162 = vmatmul.msk.f32.vlgmr.msra.gmra.mxu0 %vm79_vm0, %v75_v1  ;;  %v116_v5 = vld [vmem:[#allocation8 + $0x60] sm:$0xff]  ;;  %v115_v6 = vld [vmem:[#allocation8 + $0x58] sm:$0xff]  ;;  %v114_v7 = vld [vmem:[#allocation8 + $0x50] sm:$0xff] }
  0x16   :  { %v113_v8 = vld [vmem:[#allocation8 + $0x48] sm:$0xff]  ;;  %v112_v9 = vld [vmem:[#allocation8 + $0x40] sm:$0xff]  ;;  %v111_v10 = vld [vmem:[#allocation8 + $0x38] sm:$0xff] }
  0x17   :  { %123 = vmatpush.msra.mxu1 %v118_v3  ;;  %v110_v11 = vld [vmem:[#allocation8 + $0x30] sm:$0xff]  ;;  %v109_v12 = vld [vmem:[#allocation8 + $0x28] sm:$0xff]  ;;  %v108_v13 = vld [vmem:[#allocation8 + $0x20] sm:$0xff] }
  0x18   :  { %v107_v14 = vld [vmem:[#allocation8 + $0x18] sm:$0xff]  ;;  %v106_v15 = vld [vmem:[#allocation8 + $0x10] sm:$0xff]  ;;  %v105_v16 = vld [vmem:[#allocation8 + $0x8] sm:$0xff] }
  0x19   :  { %124 = vmatpush.msra.mxu1 %v117_v4  ;;  %v104_v17 = vld [vmem:[#allocation8] sm:$0xff]  ;;  %v170_v18 = vld [vmem:[#allocation7] ss:$0 sm:$0xff]  ;;  %v171_v22 = vld [vmem:[#allocation7 + $0x1] ss:$0 sm:$0xff] }
  0x1b   :  { %125 = vmatpush.msra.mxu1 %v116_v5 }
  0x1d   :  { %126 = vmatpush.msra.mxu1 %v115_v6 }
  0x1f   :  { %127 = vmatpush.msra.mxu1 %v114_v7 }
  0x21   :  { %128 = vmatpush.msra.mxu1 %v113_v8 }
  0x23   :  { %129 = vmatpush.msra.mxu1 %v112_v9 }
  0x25   :  { %130 = vmatpush.msra.mxu1 %v111_v10 }
  0x27   :  { %131 = vmatpush.msra.mxu1 %v110_v11 }
  0x29   :  { %132 = vmatpush.msra.mxu1 %v109_v12 }
  0x2b   :  { %133 = vmatpush.msra.mxu1 %v108_v13 }
  0x2d   :  { %134 = vmatpush.msra.mxu1 %v107_v14 }
  0x2f   :  { %135 = vmatpush.msra.mxu1 %v106_v15 }
  0x31   :  { %136 = vmatpush.msra.mxu1 %v105_v16 }
  0x33   :  { %137 = vmatpush.msra.mxu1 %v104_v17 }
  0x92   :  { %v100_v19 = vpop.f32.mrf.mxu0 }
  0x93   :  { %v101_v20 = vadd.f32 %v170_v18, %v100_v19 }
  0x95   :  { %v103_v21 = vmax.f32 %v101_v20, 0.0 }
  0x97   :  { %138 = vmatmul.f32.vlgmr.msra.gmra.mxu1 %v103_v21 }
 0x114   :  { %v139_v23 = vpop.f32.mrf.mxu1 }
 0x115   :  { %v140_v24 = vadd.f32 %v171_v22, %v139_v23 }
 0x117   :  { %142 = vst [vmem:[#allocation10] sm:$0xff] %v140_v24 }
 0x118   :  { %153 = dma.vmem_to_hbm [thread:$0]  %s149_s3, 128, %s151_s11, [#allocation4]  }
 0x119   :  { %298 = dma.done.wait [#allocation4], 128  }
 0x11a   :  { %299 = vsyncadd [#allocation4], 4294967168 }
 0x11b   :  { %158 = vsyncpa [#allocation3], 1 }
 0x11c   :  { %159 = vsyncpa [#allocation6], 1 }
 0x11d   :  { %160 = vsyncpa [#allocation9], 1 }
 0x11e   :  { %161 = vsyncpa [#allocation4], 1 }

</bundles_post_ra>
